<compile_context>
chip_gen: v7x
topology: tpu7x:2x2x1
jax: 0.10.0
libtpu: 0.0.40
codegen_flags: <defaults>
</compile_context>

<pallas_src>
import math
import jax
import jax.numpy as jnp
from jax.experimental import pallas as pl
from jax.experimental.pallas import tpu as pltpu

_INV_SQRT2 = 0.7071067811865476
_MiB = 1024 * 1024


def _round_up(x, m):
    return ((x + m - 1) // m) * m


def _tpu_config():
    """Per-generation tiling/VMEM defaults (safe fallbacks if unknown)."""
    kind = ""
    try:
        kind = jax.devices()[0].device_kind.lower()
    except Exception:
        pass
    if "v7" in kind or "7x" in kind:
        return dict(tm=512, vmem_cap=52 * _MiB, mxu_align=256, min_row_tiles=2)
    if "v6" in kind:
        return dict(tm=1024, vmem_cap=100 * _MiB, mxu_align=256, min_row_tiles=1)
    if "v5" in kind:
        return dict(tm=512, vmem_cap=100 * _MiB, mxu_align=128, min_row_tiles=1)
    return dict(tm=512, vmem_cap=64 * _MiB, mxu_align=128, min_row_tiles=1)


def _pick_subchunks(th):
    """2-4 sub-chunks (multiples of 128) so GELU overlaps the fc2 matmul."""
    for n in (4, 2):
        if th % (n * 128) == 0 and th // n >= 128:
            return n
    return 1


def _footprint(tm, th, d_model, x_bytes, out_bytes, c_bytes, n_sub):
    """Approx. VMEM bytes: double-buffered tiles + accumulator + h temp."""
    sub = th // max(n_sub, 1)
    return (2 * tm * d_model * x_bytes          # x tiles (native dtype)
            + 2 * d_model * th * c_bytes        # w1 chunks (bf16)
            + 2 * th * d_model * c_bytes        # w2 chunks (bf16)
            + 2 * th * 4 + 2 * d_model * 4      # bias chunks (f32)
            + 2 * tm * d_model * out_bytes      # out tiles
            + tm * d_model * 4                  # f32 accumulator
            + tm * sub * (4 + c_bytes))         # GELU intermediate (f32 + cast)


def _pick_th(hidden, th_req, tm, d_model, x_bytes, out_bytes, c_bytes, budget):
    """Largest hidden tile (ideally full residency) fitting the VMEM budget."""
    if hidden % 128 == 0:
        cands = [t for t in range(hidden, 0, -128) if hidden % t == 0]
    else:
        cands = [hidden]  # cannot lane-tile; guarded by budget loop below
    if th_req is not None:
        filtered = [t for t in cands if t <= th_req]
        cands = filtered if filtered else cands[-1:]
    for t in cands:
        ns = _pick_subchunks(t)
        if _footprint(tm, t, d_model, x_bytes, out_bytes, c_bytes, ns) <= budget:
            return t, ns
    t = cands[-1]
    return t, _pick_subchunks(t)


def _make_ffn_kernel(n_sub, sub, compute_dtype, multi_k):
    """Kernel factory: fused x@w1 + b1 -> GELU -> (dropout=id) -> @w2 (+b2)."""

    def _partial(x_ref, w1_ref, b1_ref, w2_ref):
        x = x_ref[...].astype(compute_dtype)
        acc = None
        # Static unrolled sub-chunk loop: fc2 matmul of chunk c overlaps the
        # erf/VPU work of chunk c+1 (independent, scheduler interleaves).
        for c in range(n_sub):
            lo, hi = c * sub, (c + 1) * sub
            h = jnp.dot(x, w1_ref[:, lo:hi], preferred_element_type=jnp.float32)
            h = h + b1_ref[:, lo:hi]
            # Exact erf-GELU (torch.nn.functional.gelu default), f32.
            h = 0.5 * h * (1.0 + jax.lax.erf(h * _INV_SQRT2))
            # TODO(synk): training-mode dropout mask (pltpu.prng_random_bits).
            p = jnp.dot(h.astype(compute_dtype), w2_ref[lo:hi, :],
                        preferred_element_type=jnp.float32)
            acc = p if acc is None else acc + p
        return acc

    if multi_k:
        def kernel(x_ref, w1_ref, b1_ref, w2_ref, b2_ref, o_ref, acc_ref):
            k = pl.program_id(1)

            @pl.when(k == 0)
            def _():
                acc_ref[...] = jnp.zeros_like(acc_ref)

            acc_ref[...] += _partial(x_ref, w1_ref, b1_ref, w2_ref)

            @pl.when(k == pl.num_programs(1) - 1)
            def _():
                o_ref[...] = (acc_ref[...] + b2_ref[...]).astype(o_ref.dtype)
    else:
        def kernel(x_ref, w1_ref, b1_ref, w2_ref, b2_ref, o_ref):
            acc = _partial(x_ref, w1_ref, b1_ref, w2_ref)
            o_ref[...] = (acc + b2_ref[...]).astype(o_ref.dtype)

    return kernel


def feed_forward(x, w1, b1, w2, b2, *, tm=None, th=None,
                 compute_dtype=jnp.bfloat16):
    """x: (..., d_model); w1: (d_model, hidden); w2: (hidden, d_model).

    Weights are stored pre-transposed as (in_features, out_features).
    Pass compute_dtype=jnp.float32 for f32-faithful results (slower).
    """
    cfg = _tpu_config()
    d_model = x.shape[-1]
    hidden = w1.shape[1]
    lead_shape = x.shape[:-1]
    M = int(math.prod(lead_shape)) if lead_shape else 1

    x_bytes = jnp.dtype(x.dtype).itemsize
    out_bytes = x_bytes
    c_bytes = jnp.dtype(compute_dtype).itemsize
    budget = cfg["vmem_cap"]

    # ---- Row tile: large (amortizes the weight stream), multiple of 16,
    # preferring MXU-filling multiples of 256 on v6e/v7x. ----
    tm_req = tm if tm is not None else cfg["tm"]
    tm_eff = min(_round_up(tm_req, 16), _round_up(M, 16))
    if tm_eff >= cfg["mxu_align"]:
        tm_eff = (tm_eff // cfg["mxu_align"]) * cfg["mxu_align"]
    # v7x: keep >= 2 row tiles so both TensorCores get work.
    if cfg["min_row_tiles"] > 1 and M > cfg["min_row_tiles"] * 16:
        tm_eff = min(tm_eff, _round_up(pl.cdiv(M, cfg["min_row_tiles"]), 16))

    # ---- Hidden tile: prefer full residency; shrink th (then tm) to fit the
    # per-generation VMEM budget. ----
    while True:
        th_eff, n_sub = _pick_th(hidden, th, tm_eff, d_model,
                                 x_bytes, out_bytes, c_bytes, budget)
        fp = _footprint(tm_eff, th_eff, d_model, x_bytes, out_bytes, c_bytes,
                        n_sub)
        if fp <= budget or tm_eff <= 128:
            break
        tm_eff = max(128, _round_up(tm_eff // 2, 16))

    sub = th_eff // n_sub
    M_pad = _round_up(M, tm_eff)
    n_row_tiles = M_pad // tm_eff
    n_k = hidden // th_eff
    multi_k = n_k > 1

    # ---- Inputs (x kept in native dtype; cast happens inside the kernel). ----
    x2d = x.reshape(M, d_model)
    if M_pad != M:
        x2d = jnp.pad(x2d, ((0, M_pad - M), (0, 0)))
    w1c = w1.astype(compute_dtype)          # no-op if already stored as bf16
    w2c = w2.astype(compute_dtype)
    b1_2d = b1.reshape(1, hidden).astype(jnp.float32)
    b2_2d = b2.reshape(1, d_model).astype(jnp.float32)

    vmem_limit = int(min(budget, max(32 * _MiB, int(fp * 1.25) + 2 * _MiB)))

    weight_streams = 1 if not multi_k else n_row_tiles
    cost = pl.CostEstimate(
        flops=4 * M_pad * d_model * hidden,            # two matmuls
        transcendentals=M_pad * hidden,                # erf per fc1 activation
        bytes_accessed=(
            M_pad * d_model * x_bytes
            + weight_streams * 2 * d_model * hidden * c_bytes
            + hidden * 4 + d_model * 4
            + M_pad * d_model * out_bytes
        ),
    )

    kernel = _make_ffn_kernel(n_sub, sub, compute_dtype, multi_k)

    if multi_k:
        grid = (n_row_tiles, n_k)
        in_specs = [
            pl.BlockSpec((tm_eff, d_model), lambda i, k: (i, 0)),   # x rows
            pl.BlockSpec((d_model, th_eff), lambda i, k: (0, k)),   # w1 chunk
            pl.BlockSpec((1, th_eff), lambda i, k: (0, k)),         # b1 chunk
            pl.BlockSpec((th_eff, d_model), lambda i, k: (k, 0)),   # w2 chunk
            pl.BlockSpec((1, d_model), lambda i, k: (0, 0)),        # b2
        ]
        out_specs = pl.BlockSpec((tm_eff, d_model), lambda i, k: (i, 0))
        scratch_shapes = [pltpu.VMEM((tm_eff, d_model), jnp.float32)]
        dims = ("parallel", "arbitrary")
    else:
        # Weight block index is constant over the whole grid -> each weight is
        # DMA'd from HBM exactly once (VMEM-resident across row tiles).
        grid = (n_row_tiles,)
        in_specs = [
            pl.BlockSpec((tm_eff, d_model), lambda i: (i, 0)),
            pl.BlockSpec((d_model, hidden), lambda i: (0, 0)),
            pl.BlockSpec((1, hidden), lambda i: (0, 0)),
            pl.BlockSpec((hidden, d_model), lambda i: (0, 0)),
            pl.BlockSpec((1, d_model), lambda i: (0, 0)),
        ]
        out_specs = pl.BlockSpec((tm_eff, d_model), lambda i: (i, 0))
        scratch_shapes = []
        dims = ("parallel",)

    out = pl.pallas_call(
        kernel,
        out_shape=jax.ShapeDtypeStruct((M_pad, d_model), x.dtype),
        grid_spec=pltpu.PrefetchScalarGridSpec(
            num_scalar_prefetch=0,
            grid=grid,
            in_specs=in_specs,
            out_specs=out_specs,
            scratch_shapes=scratch_shapes,
        ),
        compiler_params=pltpu.CompilerParams(
            dimension_semantics=dims,
            vmem_limit_bytes=vmem_limit,
        ),
        cost_estimate=cost,
    )(x2d, w1c, b1_2d, w2c, b2_2d)

    if M_pad != M:
        out = out[:M]
    return out.reshape(*lead_shape, d_model)


def feed_forward_ref(x, w1, b1, w2, b2):
    """Pure-JAX f32 reference matching the PyTorch forward (eval mode)."""
    h = jnp.dot(x, w1) + b1
    h = 0.5 * h * (1.0 + jax.lax.erf(h * _INV_SQRT2))
    return jnp.dot(h, w2) + b2


if __name__ == "__main__":
    # Small shapes consistent with the module's forward:
    # x: (batch=2, seq=8, d_model=128), hidden_dim=512 (lane-dense last dims).
    d_model, hidden_dim = 128, 512
    B, S = 2, 8

    key = jax.random.PRNGKey(0)
    kx, kw1, kb1, kw2, kb2 = jax.random.split(key, 5)

    x = jax.random.normal(kx, (B, S, d_model), dtype=jnp.float32)

    # Deterministic init mimicking nn.Linear (uniform(-1/sqrt(fan_in), +...)),
    # stored pre-transposed as (in, out).
    lim1 = 1.0 / math.sqrt(d_model)
    w1 = jax.random.uniform(kw1, (d_model, hidden_dim), jnp.float32, -lim1, lim1)
    b1 = jax.random.uniform(kb1, (hidden_dim,), jnp.float32, -lim1, lim1)
    lim2 = 1.0 / math.sqrt(hidden_dim)
    w2 = jax.random.uniform(kw2, (hidden_dim, d_model), jnp.float32, -lim2, lim2)
    b2 = jax.random.uniform(kb2, (d_model,), jnp.float32, -lim2, lim2)

    ref = feed_forward_ref(x, w1, b1, w2, b2)

    # Path 1: default tiling -> weights VMEM-resident, 1-D grid, sub-chunked
    # GELU/fc2 overlap.
    out1 = jax.block_until_ready(feed_forward(x, w1, b1, w2, b2))
    assert out1.shape == (B, S, d_model)
    assert jnp.allclose(out1, ref, atol=3e-2, rtol=3e-2), float(
        jnp.max(jnp.abs(out1 - ref)))

    # Path 2: force hidden tiling (th=128) -> exercises the multi-step f32
    # accumulator ("arbitrary" reduction axis) path.
    out2 = jax.block_until_ready(feed_forward(x, w1, b1, w2, b2, th=128))
    assert jnp.allclose(out2, ref, atol=3e-2, rtol=3e-2), float(
        jnp.max(jnp.abs(out2 - ref)))

    print("KERNEL_OK")
</pallas_src>

<mosaic_0001>
module attributes {stable_mosaic.version = 11 : i64} {
  func.func @kernel(%arg0: i32, %arg1: memref<16x128xf32, #tpu.memory_space<vmem>>, %arg2: memref<128x512xbf16, #tpu.memory_space<vmem>>, %arg3: memref<1x512xf32, #tpu.memory_space<vmem>>, %arg4: memref<512x128xbf16, #tpu.memory_space<vmem>>, %arg5: memref<1x128xf32, #tpu.memory_space<vmem>>, %arg6: memref<16x128xf32, #tpu.memory_space<vmem>>) attributes {dimension_semantics = [#tpu.dimension_semantics<parallel>], iteration_bounds = array<i64: 1>, scalar_prefetch = 0 : i64, scratch_operands = 0 : i64, tpu.core_type = #tpu.core_type<tc>, window_params = [{transform_indices = @transform_0, window_bounds = array<i64: 16, 128>}, {pipeline_mode = #tpu.pipeline_mode<synchronous>, transform_indices = @transform_1, window_bounds = array<i64: 128, 512>}, {pipeline_mode = #tpu.pipeline_mode<synchronous>, transform_indices = @transform_2, window_bounds = array<i64: 1, 512>}, {pipeline_mode = #tpu.pipeline_mode<synchronous>, transform_indices = @transform_3, window_bounds = array<i64: 512, 128>}, {pipeline_mode = #tpu.pipeline_mode<synchronous>, transform_indices = @transform_4, window_bounds = array<i64: 1, 128>}, {transform_indices = @transform_5, window_bounds = array<i64: 16, 128>}]} {
    %c0 = arith.constant 0 : index
    %c0_0 = arith.constant 0 : index
    %0 = vector.load %arg1[%c0, %c0_0] : memref<16x128xf32, #tpu.memory_space<vmem>>, vector<16x128xf32>
    %1 = arith.truncf %0 : vector<16x128xf32> to vector<16x128xbf16>
    %c0_1 = arith.constant 0 : index
    %c0_2 = arith.constant 0 : index
    %2 = vector.load %arg2[%c0_1, %c0_2] : memref<128x512xbf16, #tpu.memory_space<vmem>>, vector<128x128xbf16>
    %cst = arith.constant dense<0.000000e+00> : vector<16x128xf32>
    %3 = tpu.matmul %1, %2, %cst {dimension_numbers = #tpu.dot_dimension_numbers<[1], [0], [0], [1], [0, 0, 1, 1], [], []>} : vector<16x128xbf16>, vector<128x128xbf16>, vector<16x128xf32> -> vector<16x128xf32>
    %c0_3 = arith.constant 0 : index
    %c0_4 = arith.constant 0 : index
    %4 = vector.load %arg3[%c0_3, %c0_4] : memref<1x512xf32, #tpu.memory_space<vmem>>, vector<1x128xf32>
    %5 = vector.broadcast %4 : vector<1x128xf32> to vector<16x128xf32>
    %6 = arith.addf %3, %5 : vector<16x128xf32>
    %cst_5 = arith.constant 5.000000e-01 : f32
    %7 = vector.broadcast %cst_5 : f32 to vector<16x128xf32>
    %8 = arith.mulf %7, %6 : vector<16x128xf32>
    %cst_6 = arith.constant 0.707106769 : f32
    %9 = vector.broadcast %cst_6 : f32 to vector<16x128xf32>
    %10 = arith.mulf %6, %9 : vector<16x128xf32>
    %11 = math.erf %10 : vector<16x128xf32>
    %cst_7 = arith.constant 1.000000e+00 : f32
    %12 = vector.broadcast %cst_7 : f32 to vector<16x128xf32>
    %13 = arith.addf %12, %11 : vector<16x128xf32>
    %14 = arith.mulf %8, %13 : vector<16x128xf32>
    %15 = arith.truncf %14 : vector<16x128xf32> to vector<16x128xbf16>
    %c0_8 = arith.constant 0 : index
    %c0_9 = arith.constant 0 : index
    %16 = vector.load %arg4[%c0_8, %c0_9] : memref<512x128xbf16, #tpu.memory_space<vmem>>, vector<128x128xbf16>
    %cst_10 = arith.constant dense<0.000000e+00> : vector<16x128xf32>
    %17 = tpu.matmul %15, %16, %cst_10 {dimension_numbers = #tpu.dot_dimension_numbers<[1], [0], [0], [1], [0, 0, 1, 1], [], []>} : vector<16x128xbf16>, vector<128x128xbf16>, vector<16x128xf32> -> vector<16x128xf32>
    %c0_11 = arith.constant 0 : index
    %c128 = arith.constant 128 : index
    %18 = vector.load %arg2[%c0_11, %c128] : memref<128x512xbf16, #tpu.memory_space<vmem>>, vector<128x128xbf16>
    %cst_12 = arith.constant dense<0.000000e+00> : vector<16x128xf32>
    %19 = tpu.matmul %1, %18, %cst_12 {dimension_numbers = #tpu.dot_dimension_numbers<[1], [0], [0], [1], [0, 0, 1, 1], [], []>} : vector<16x128xbf16>, vector<128x128xbf16>, vector<16x128xf32> -> vector<16x128xf32>
    %c0_13 = arith.constant 0 : index
    %c128_14 = arith.constant 128 : index
    %20 = vector.load %arg3[%c0_13, %c128_14] : memref<1x512xf32, #tpu.memory_space<vmem>>, vector<1x128xf32>
    %21 = vector.broadcast %20 : vector<1x128xf32> to vector<16x128xf32>
    %22 = arith.addf %19, %21 : vector<16x128xf32>
    %cst_15 = arith.constant 5.000000e-01 : f32
    %23 = vector.broadcast %cst_15 : f32 to vector<16x128xf32>
    %24 = arith.mulf %23, %22 : vector<16x128xf32>
    %cst_16 = arith.constant 0.707106769 : f32
    %25 = vector.broadcast %cst_16 : f32 to vector<16x128xf32>
    %26 = arith.mulf %22, %25 : vector<16x128xf32>
    %27 = math.erf %26 : vector<16x128xf32>
    %cst_17 = arith.constant 1.000000e+00 : f32
    %28 = vector.broadcast %cst_17 : f32 to vector<16x128xf32>
    %29 = arith.addf %28, %27 : vector<16x128xf32>
    %30 = arith.mulf %24, %29 : vector<16x128xf32>
    %31 = arith.truncf %30 : vector<16x128xf32> to vector<16x128xbf16>
    %c128_18 = arith.constant 128 : index
    %c0_19 = arith.constant 0 : index
    %32 = vector.load %arg4[%c128_18, %c0_19] : memref<512x128xbf16, #tpu.memory_space<vmem>>, vector<128x128xbf16>
    %cst_20 = arith.constant dense<0.000000e+00> : vector<16x128xf32>
    %33 = tpu.matmul %31, %32, %cst_20 {dimension_numbers = #tpu.dot_dimension_numbers<[1], [0], [0], [1], [0, 0, 1, 1], [], []>} : vector<16x128xbf16>, vector<128x128xbf16>, vector<16x128xf32> -> vector<16x128xf32>
    %34 = arith.addf %17, %33 : vector<16x128xf32>
    %c0_21 = arith.constant 0 : index
    %c256 = arith.constant 256 : index
    %35 = vector.load %arg2[%c0_21, %c256] : memref<128x512xbf16, #tpu.memory_space<vmem>>, vector<128x128xbf16>
    %cst_22 = arith.constant dense<0.000000e+00> : vector<16x128xf32>
    %36 = tpu.matmul %1, %35, %cst_22 {dimension_numbers = #tpu.dot_dimension_numbers<[1], [0], [0], [1], [0, 0, 1, 1], [], []>} : vector<16x128xbf16>, vector<128x128xbf16>, vector<16x128xf32> -> vector<16x128xf32>
    %c0_23 = arith.constant 0 : index
    %c256_24 = arith.constant 256 : index
    %37 = vector.load %arg3[%c0_23, %c256_24] : memref<1x512xf32, #tpu.memory_space<vmem>>, vector<1x128xf32>
    %38 = vector.broadcast %37 : vector<1x128xf32> to vector<16x128xf32>
    %39 = arith.addf %36, %38 : vector<16x128xf32>
    %cst_25 = arith.constant 5.000000e-01 : f32
    %40 = vector.broadcast %cst_25 : f32 to vector<16x128xf32>
    %41 = arith.mulf %40, %39 : vector<16x128xf32>
    %cst_26 = arith.constant 0.707106769 : f32
    %42 = vector.broadcast %cst_26 : f32 to vector<16x128xf32>
    %43 = arith.mulf %39, %42 : vector<16x128xf32>
    %44 = math.erf %43 : vector<16x128xf32>
    %cst_27 = arith.constant 1.000000e+00 : f32
    %45 = vector.broadcast %cst_27 : f32 to vector<16x128xf32>
    %46 = arith.addf %45, %44 : vector<16x128xf32>
    %47 = arith.mulf %41, %46 : vector<16x128xf32>
    %48 = arith.truncf %47 : vector<16x128xf32> to vector<16x128xbf16>
    %c256_28 = arith.constant 256 : index
    %c0_29 = arith.constant 0 : index
    %49 = vector.load %arg4[%c256_28, %c0_29] : memref<512x128xbf16, #tpu.memory_space<vmem>>, vector<128x128xbf16>
    %cst_30 = arith.constant dense<0.000000e+00> : vector<16x128xf32>
    %50 = tpu.matmul %48, %49, %cst_30 {dimension_numbers = #tpu.dot_dimension_numbers<[1], [0], [0], [1], [0, 0, 1, 1], [], []>} : vector<16x128xbf16>, vector<128x128xbf16>, vector<16x128xf32> -> vector<16x128xf32>
    %51 = arith.addf %34, %50 : vector<16x128xf32>
    %c0_31 = arith.constant 0 : index
    %c384 = arith.constant 384 : index
    %52 = vector.load %arg2[%c0_31, %c384] : memref<128x512xbf16, #tpu.memory_space<vmem>>, vector<128x128xbf16>
    %cst_32 = arith.constant dense<0.000000e+00> : vector<16x128xf32>
    %53 = tpu.matmul %1, %52, %cst_32 {dimension_numbers = #tpu.dot_dimension_numbers<[1], [0], [0], [1], [0, 0, 1, 1], [], []>} : vector<16x128xbf16>, vector<128x128xbf16>, vector<16x128xf32> -> vector<16x128xf32>
    %c0_33 = arith.constant 0 : index
    %c384_34 = arith.constant 384 : index
    %54 = vector.load %arg3[%c0_33, %c384_34] : memref<1x512xf32, #tpu.memory_space<vmem>>, vector<1x128xf32>
    %55 = vector.broadcast %54 : vector<1x128xf32> to vector<16x128xf32>
    %56 = arith.addf %53, %55 : vector<16x128xf32>
    %cst_35 = arith.constant 5.000000e-01 : f32
    %57 = vector.broadcast %cst_35 : f32 to vector<16x128xf32>
    %58 = arith.mulf %57, %56 : vector<16x128xf32>
    %cst_36 = arith.constant 0.707106769 : f32
    %59 = vector.broadcast %cst_36 : f32 to vector<16x128xf32>
    %60 = arith.mulf %56, %59 : vector<16x128xf32>
    %61 = math.erf %60 : vector<16x128xf32>
    %cst_37 = arith.constant 1.000000e+00 : f32
    %62 = vector.broadcast %cst_37 : f32 to vector<16x128xf32>
    %63 = arith.addf %62, %61 : vector<16x128xf32>
    %64 = arith.mulf %58, %63 : vector<16x128xf32>
    %65 = arith.truncf %64 : vector<16x128xf32> to vector<16x128xbf16>
    %c384_38 = arith.constant 384 : index
    %c0_39 = arith.constant 0 : index
    %66 = vector.load %arg4[%c384_38, %c0_39] : memref<512x128xbf16, #tpu.memory_space<vmem>>, vector<128x128xbf16>
    %cst_40 = arith.constant dense<0.000000e+00> : vector<16x128xf32>
    %67 = tpu.matmul %65, %66, %cst_40 {dimension_numbers = #tpu.dot_dimension_numbers<[1], [0], [0], [1], [0, 0, 1, 1], [], []>} : vector<16x128xbf16>, vector<128x128xbf16>, vector<16x128xf32> -> vector<16x128xf32>
    %68 = arith.addf %51, %67 : vector<16x128xf32>
    %c0_41 = arith.constant 0 : index
    %c0_42 = arith.constant 0 : index
    %69 = vector.load %arg5[%c0_41, %c0_42] : memref<1x128xf32, #tpu.memory_space<vmem>>, vector<1x128xf32>
    %70 = vector.broadcast %69 : vector<1x128xf32> to vector<16x128xf32>
    %71 = arith.addf %68, %70 : vector<16x128xf32>
    %c0_43 = arith.constant 0 : index
    %c0_44 = arith.constant 0 : index
    %72 = vector.load %arg6[%c0_43, %c0_44] : memref<16x128xf32, #tpu.memory_space<vmem>>, vector<16x128xf32>
    tpu.vector_store %arg6[%c0_43, %c0_44], %71 {strides = array<i32>} : memref<16x128xf32, #tpu.memory_space<vmem>>, vector<16x128xf32>,
    return
  }
  func.func @transform_0(%arg0: i32) -> (i32, i32) {
    %c0_i32 = arith.constant 0 : i32
    %c0_i32_0 = arith.constant 0 : i32
    return %arg0, %c0_i32 : i32, i32
  }
  func.func @transform_1(%arg0: i32) -> (i32, i32) {
    %c0_i32 = arith.constant 0 : i32
    %c0_i32_0 = arith.constant 0 : i32
    %c0_i32_1 = arith.constant 0 : i32
    return %c0_i32, %c0_i32_0 : i32, i32
  }
  func.func @transform_2(%arg0: i32) -> (i32, i32) {
    %c0_i32 = arith.constant 0 : i32
    %c0_i32_0 = arith.constant 0 : i32
    %c0_i32_1 = arith.constant 0 : i32
    return %c0_i32, %c0_i32_0 : i32, i32
  }
  func.func @transform_3(%arg0: i32) -> (i32, i32) {
    %c0_i32 = arith.constant 0 : i32
    %c0_i32_0 = arith.constant 0 : i32
    %c0_i32_1 = arith.constant 0 : i32
    return %c0_i32, %c0_i32_0 : i32, i32
  }
  func.func @transform_4(%arg0: i32) -> (i32, i32) {
    %c0_i32 = arith.constant 0 : i32
    %c0_i32_0 = arith.constant 0 : i32
    %c0_i32_1 = arith.constant 0 : i32
    return %c0_i32, %c0_i32_0 : i32, i32
  }
  func.func @transform_5(%arg0: i32) -> (i32, i32) {
    %c0_i32 = arith.constant 0 : i32
    %c0_i32_0 = arith.constant 0 : i32
    return %arg0, %c0_i32 : i32, i32
  }
}

</mosaic_0001>

<bundles_post_ra>
// kernel: tpu_custom_call.1
= control target key start
LH: loop header
LB: loop body
LE: loop exit
PB: predicated region body
PF: predicated region fallthrough
CT: control target
= control target key end

     0   :  { %10 = vsyncpa [#allocation3], 0  ;;  %s1701_s0 = inlined_call_operand.hbm [shape: f32[16,128], index: 0, kind: input, shape index: {}]   ;;  %s1702_s1 = inlined_call_operand.hbm [shape: bf16[128,512], index: 1, kind: input, shape index: {}]   ;;  %s1703_s2 = inlined_call_operand.vmem [shape: f32[1,512], index: 2, kind: input, shape index: {}]   ;;  %s1704_s3 = inlined_call_operand.hbm [shape: bf16[512,128], index: 3, kind: input, shape index: {}]   ;;  %s1705_s4 = inlined_call_operand.vmem [shape: f32[1,128], index: 4, kind: input, shape index: {}]   ;;  %s1706_s5 = inlined_call_operand.hbm [shape: f32[16,128], index: 5, kind: output, shape index: {}]  }
   0x1   :  { %11 = vsyncpa [#allocation6], 0 }
   0x2   :  { %12 = vsyncpa [#allocation4], 0  ;;  %s1498_s18 = smov [#allocation5]   ;;  %s1404_s22 = scalar_lea.hbm %s1702_s1, 4096 }
   0x3   :  { %s30_s19 = sshll.u32 %s1498_s18, 4  ;;  %p1405_p0 = scmp.ne.s32.totalorder %s1702_s1, %s1404_s22  ;;  %s31_s19 = int_to_ptr.vmem [resolvable:$true] %s30_s19 }
   0x4   :  { %p1408_p1 = scmp.lt.u32.totalorder %s1404_s22, %s1702_s1 }
   0x6   :  { %p1410_p2 = pnand %p1408_p1, %p1405_p0 }
   0x8   :  { %1413 = shalt.err (!%p1410_p2)
}
   0x9   :  { %s1414_s27 = scalar_lea.vmem %s31_s19, 4096  ;;  %p1419_p4 = scmp.lt.s32.totalorder %s31_s19, %s31_s19 }
   0xa   :  { %p1415_p3 = scmp.ne.s32.totalorder %s31_s19, %s1414_s27  ;;  %p1420_p5 = scmp.lt.s32.totalorder %s1414_s27, %s1414_s27 }
   0xc   :  { %p1421_p6 = por %p1420_p5, %p1419_p4 }
   0xe   :  { %p1422_p7 = pnand %p1421_p6, %p1415_p3 }
  0x10   :  { %1425 = shalt.err (!%p1422_p7)
}
  0x11   :  { %s1499_s28 = smov 256   ;;  %s1500_s29 = smov 16  }
  0x12   :  { %36 = dma.hbm_to_vmem [thread:$0]  %s1702_s1, 4096, %s31_s19, [#allocation6], %s1499_s28, %s1499_s28, %s1500_s29  }
  0x13   :  { %s1501_s7 = smov [#allocation2]   ;;  %s1426_s11 = scalar_lea.hbm %s1701_s0, 256 }
  0x14   :  { %s18_s8 = sshll.u32 %s1501_s7, 4  ;;  %p1427_p8 = scmp.ne.s32.totalorder %s1701_s0, %s1426_s11  ;;  %s19_s8 = int_to_ptr.vmem [resolvable:$true] %s18_s8 }
  0x15   :  { %p1430_p9 = scmp.lt.u32.totalorder %s1426_s11, %s1701_s0 }
  0x17   :  { %p1432_p10 = pnand %p1430_p9, %p1427_p8 }
  0x19   :  { %1435 = shalt.err (!%p1432_p10)
}
  0x1a   :  { %s1436_s16 = scalar_lea.vmem %s19_s8, 256  ;;  %p1441_p12 = scmp.lt.s32.totalorder %s19_s8, %s19_s8 }
  0x1b   :  { %p1437_p11 = scmp.ne.s32.totalorder %s19_s8, %s1436_s16  ;;  %p1442_p13 = scmp.lt.s32.totalorder %s1436_s16, %s1436_s16 }
  0x1d   :  { %p1443_p0 = por %p1442_p13, %p1441_p12 }
  0x1f   :  { %p1444_p1 = pnand %p1443_p0, %p1437_p11 }
  0x21   :  { %1447 = shalt.err (!%p1444_p1)
}
  0x22   :  { %s1502_s1 = smov 128   ;;  %s1503_s17 = smov 8  }
  0x23   :  { %24 = dma.hbm_to_vmem [thread:$0]  %s1701_s0, 256, %s19_s8, [#allocation3], %s1502_s1, %s1502_s1, %s1503_s17  }
  0x24   :  { %s1504_s20 = smov [#allocation7]   ;;  %s1448_s24 = scalar_lea.hbm %s1704_s3, 4096 }
  0x25   :  { %s44_s21 = sshll.u32 %s1504_s20, 4  ;;  %p1449_p2 = scmp.ne.s32.totalorder %s1704_s3, %s1448_s24  ;;  %s45_s21 = int_to_ptr.vmem [resolvable:$true] %s44_s21 }
  0x26   :  { %p1452_p3 = scmp.lt.u32.totalorder %s1448_s24, %s1704_s3 }
  0x28   :  { %p1454_p4 = pnand %p1452_p3, %p1449_p2 }
  0x2a   :  { %1457 = shalt.err (!%p1454_p4)
}
  0x2b   :  { %s1458_s29 = scalar_lea.vmem %s45_s21, 4096  ;;  %p1463_p6 = scmp.lt.s32.totalorder %s45_s21, %s45_s21 }
  0x2c   :  { %p1459_p5 = scmp.ne.s32.totalorder %s45_s21, %s1458_s29  ;;  %p1464_p7 = scmp.lt.s32.totalorder %s1458_s29, %s1458_s29 }
  0x2e   :  { %p1465_p8 = por %p1464_p7, %p1463_p6 }
  0x30   :  { %p1466_p9 = pnand %p1465_p8, %p1459_p5 }
  0x32   :  { %1469 = shalt.err (!%p1466_p9)
}
  0x33   :  { %s1505_s0 = smov 64   ;;  %s1506_s30 = smov 4  }
  0x34   :  { %50 = dma.hbm_to_vmem [thread:$0]  %s1704_s3, 4096, %s45_s21, [#allocation6], %s1505_s0, %s1505_s0, %s1506_s30  }
  0x35   :  { %1492 = dma.done.wait [#allocation3], 256  }
  0x36   :  { %1493 = vsyncadd [#allocation3], 4294967040 }
  0x37   :  { %1494 = dma.done.wait [#allocation6], 8192  }
  0x38   :  { %1495 = vsyncadd [#allocation6], 4294959104  ;;  %v1507_v0 = vmov 0.0   ;;  %vm1508_vm0 = vmmov 0   ;;  %v1324_v1 = vld [vmem:[#allocation5] ss:$16 sps:$4 sm:$0xff]  }
  0x39   :  { %1152 = vmatprep.subr.bf16.mxu0 %v1507_v0  ;;  %1172 = vmatprep.subr.bf16.mxu1 %v1507_v0  ;;  %v1325_v2 = vld [vmem:[#allocation5 + $0x4] ss:$16 sps:$4 sm:$0xff]   ;;  %v1326_v3 = vld [vmem:[#allocation5 + $0x20] ss:$16 sps:$4 sm:$0xff]   ;;  %v64_v17 = vld [vmem:[#allocation2 + $0x8] sm:$0xff]  ;;  %s1509_s16 = smov [#allocation8]  }
  0x3a   :  { %1168 = vmatprep.mubr.msk.bf16.mxu0 %vm1508_vm0, %v1507_v0  ;;  %1188 = vmatprep.mubr.msk.bf16.mxu1 %vm1508_vm0, %v1507_v0  ;;  %v1327_v4 = vld [vmem:[#allocation5 + $0x24] ss:$16 sps:$4 sm:$0xff]   ;;  %v1328_v5 = vld [vmem:[#allocation5 + $0x40] ss:$16 sps:$4 sm:$0xff]   ;;  %v1342_v22 = vld [vmem:[#allocation7 + $0x48] sm:$0xff]   ;;  %s998_s18 = sshll.u32 %s1509_s16, 4  ;;  %s999_s18 = int_to_ptr.vmem [resolvable:$true] %s998_s18 }
  0x3b   :  { %1153 = vmatpush3.bf16.msra.mxu0 %v1324_v1  ;;  %1173 = vmatpush3.bf16.msra.mxu1 %v1325_v2  ;;  %v1329_v6 = vld [vmem:[#allocation5 + $0x44] ss:$16 sps:$4 sm:$0xff]   ;;  %v1330_v7 = vld [vmem:[#allocation5 + $0x60] ss:$16 sps:$4 sm:$0xff]   ;;  %v1343_v23 = vld [vmem:[#allocation7 + $0x8] sm:$0xff]   ;;  %s1470_s19 = scalar_lea.vmem %s999_s18, 256  ;;  %p1475_p11 = scmp.lt.s32.totalorder %s999_s18, %s999_s18 }
  0x3c   :  { %1154 = vmatprep.subr.bf16.mxu0 %v1507_v0  ;;  %1174 = vmatprep.subr.bf16.mxu1 %v1507_v0  ;;  %v1331_v8 = vld [vmem:[#allocation5 + $0x64] ss:$16 sps:$4 sm:$0xff]   ;;  %v1332_v9 = vld [vmem:[#allocation5 + $0x80] ss:$16 sps:$4 sm:$0xff]   ;;  %v1346_v26 = vld [vmem:[#allocation7 + $0x58] sm:$0xff]   ;;  %p1471_p10 = scmp.ne.s32.totalorder %s999_s18, %s1470_s19  ;;  %p1476_p12 = scmp.lt.s32.totalorder %s1470_s19, %s1470_s19 }
  0x3d   :  { %v1333_v10 = vld [vmem:[#allocation5 + $0x84] ss:$16 sps:$4 sm:$0xff]   ;;  %v1334_v11 = vld [vmem:[#allocation5 + $0xa0] ss:$16 sps:$4 sm:$0xff]   ;;  %v1347_v27 = vld [vmem:[#allocation7 + $0x18] sm:$0xff]  }
  0x3e   :  { %v1335_v12 = vld [vmem:[#allocation5 + $0xa4] ss:$16 sps:$4 sm:$0xff]   ;;  %v1336_v13 = vld [vmem:[#allocation5 + $0xc0] ss:$16 sps:$4 sm:$0xff]   ;;  %v1350_v30 = vld [vmem:[#allocation7 + $0x68] sm:$0xff]   ;;  %p1477_p13 = por %p1476_p12, %p1475_p11 }
  0x3f   :  { %1155 = vmatpush3.bf16.msra.mxu0 %v1326_v3  ;;  %1175 = vmatpush3.bf16.msra.mxu1 %v1327_v4  ;;  %v1337_v14 = vld [vmem:[#allocation5 + $0xc4] ss:$16 sps:$4 sm:$0xff]   ;;  %v1338_v15 = vld [vmem:[#allocation5 + $0xe0] ss:$16 sps:$4 sm:$0xff]   ;;  %v1351_v31 = vld [vmem:[#allocation7 + $0x28] sm:$0xff]  }
  0x40   :  { %1156 = vmatprep.subr.bf16.mxu0 %v1507_v0  ;;  %1176 = vmatprep.subr.bf16.mxu1 %v1507_v0  ;;  %v63_v16 = vld [vmem:[#allocation2] sm:$0xff]  ;;  %v1340_v19 = vld [vmem:[#allocation7 + $0x40] sm:$0xff]   ;;  %v1354_v34 = vld [vmem:[#allocation7 + $0x78] sm:$0xff]   ;;  %p1478_p0 = pnand %p1477_p13, %p1471_p10 }
  0x41   :  { %v1339_v18 = vld [vmem:[#allocation5 + $0xe4] ss:$16 sps:$4 sm:$0xff]   ;;  %v1599_v20 = vpack.c.bf16 %v64_v17, %v63_v16  ;;  %v1355_v35 = vld [vmem:[#allocation7 + $0x38] sm:$0xff]   ;;  %v1011_v36 = vld [vmem:[%s1703_s2] ss:$0 sm:$0xff] }
  0x42   :  { %v1341_v21 = vld [vmem:[#allocation7] sm:$0xff]   ;;  %v1344_v24 = vld [vmem:[#allocation7 + $0x50] sm:$0xff]   ;;  %v1363_v16 = vld [vmem:[#allocation5 + $0xe8] ss:$16 sps:$4 sm:$0xff]  }
  0x43   :  { %1157 = vmatpush3.bf16.msra.mxu0 %v1328_v5  ;;  %1177 = vmatpush3.bf16.msra.mxu1 %v1329_v6  ;;  %v1345_v25 = vld [vmem:[#allocation7 + $0x10] sm:$0xff]   ;;  %v1348_v28 = vld [vmem:[#allocation7 + $0x60] sm:$0xff]   ;;  %v1364_v17 = vld [vmem:[#allocation5 + $0xc] ss:$16 sps:$4 sm:$0xff]  }
  0x44   :  { %1158 = vmatprep.subr.bf16.mxu0 %v1507_v0  ;;  %1178 = vmatprep.subr.bf16.mxu1 %v1507_v0  ;;  %v1349_v29 = vld [vmem:[#allocation7 + $0x20] sm:$0xff]   ;;  %v1352_v32 = vld [vmem:[#allocation7 + $0x70] sm:$0xff]  }
  0x45   :  { %v1353_v33 = vld [vmem:[#allocation7 + $0x30] sm:$0xff]  }
  0x46   :  { %v1020_v37 = vld [vmem:[%s1703_s2 + $0x1] ss:$0 sm:$0xff] }
  0x47   :  { %1159 = vmatpush3.bf16.msra.mxu0 %v1330_v7  ;;  %1179 = vmatpush3.bf16.msra.mxu1 %v1331_v8  ;;  %v1356_v8 = vld [vmem:[#allocation5 + $0x8] ss:$16 sps:$4 sm:$0xff]  }
  0x48   :  { %1160 = vmatprep.subr.bf16.mxu0 %v1507_v0  ;;  %1180 = vmatprep.subr.bf16.mxu1 %v1507_v0 }
  0x4b   :  { %1161 = vmatpush3.bf16.msra.mxu0 %v1332_v9  ;;  %1181 = vmatpush3.bf16.msra.mxu1 %v1333_v10  ;;  %v1357_v10 = vld [vmem:[#allocation5 + $0x28] ss:$16 sps:$4 sm:$0xff]  }
  0x4c   :  { %1162 = vmatprep.subr.bf16.mxu0 %v1507_v0  ;;  %1182 = vmatprep.subr.bf16.mxu1 %v1507_v0 }
  0x4f   :  { %1163 = vmatpush3.bf16.msra.mxu0 %v1334_v11  ;;  %1183 = vmatpush3.bf16.msra.mxu1 %v1335_v12  ;;  %v1358_v11 = vld [vmem:[#allocation5 + $0x48] ss:$16 sps:$4 sm:$0xff]  }
  0x50   :  { %1164 = vmatprep.subr.bf16.mxu0 %v1507_v0  ;;  %1184 = vmatprep.subr.bf16.mxu1 %v1507_v0  ;;  %v1359_v12 = vld [vmem:[#allocation5 + $0x68] ss:$16 sps:$4 sm:$0xff]  }
  0x53   :  { %1165 = vmatpush3.bf16.msra.mxu0 %v1336_v13  ;;  %1185 = vmatpush3.bf16.msra.mxu1 %v1337_v14  ;;  %v1360_v13 = vld [vmem:[#allocation5 + $0x88] ss:$16 sps:$4 sm:$0xff]  }
  0x54   :  { %1166 = vmatprep.subr.bf16.mxu0 %v1507_v0  ;;  %1186 = vmatprep.subr.bf16.mxu1 %v1507_v0  ;;  %v1361_v14 = vld [vmem:[#allocation5 + $0xa8] ss:$16 sps:$4 sm:$0xff]  }
  0x57   :  { %1167 = vmatpush3.bf16.msra.mxu0 %v1338_v15  ;;  %1187 = vmatpush3.bf16.msra.mxu1 %v1339_v18  ;;  %v1362_v15 = vld [vmem:[#allocation5 + $0xc8] ss:$16 sps:$4 sm:$0xff]   ;;  %v1365_v18 = vld [vmem:[#allocation5 + $0x2c] ss:$16 sps:$4 sm:$0xff]  }
  0x58   :  { %1192 = vmatprep.subr.bf16.mxu0 %v1507_v0  ;;  %1212 = vmatprep.subr.bf16.mxu1 %v1507_v0 }
  0x5a   :  { %1169 = vmatmul.mubr.bf16.vlgmr.msra.gmra.mrb[0].mxu0 %v1599_v20  ;;  %1189 = vmatmul.mubr.bf16.vlgmr.msra.gmra.mrb[0].mxu1 %v1599_v20 }
  0x5b   :  { %1193 = vmatpush3.bf16.msra.mxu0 %v1340_v19  ;;  %1213 = vmatpush3.bf16.msra.mxu1 %v1341_v21  ;;  %v1366_v19 = vld [vmem:[#allocation5 + $0x4c] ss:$16 sps:$4 sm:$0xff]  }
  0x5c   :  { %1194 = vmatprep.subr.bf16.mxu0 %v1507_v0  ;;  %1214 = vmatprep.subr.bf16.mxu1 %v1507_v0  ;;  %v1367_v21 = vld [vmem:[#allocation5 + $0x6c] ss:$16 sps:$4 sm:$0xff]  }
  0x5d   :  { %1208 = vmatprep.mubr.msk.bf16.mxu0 %vm1508_vm0, %v1507_v0  ;;  %1228 = vmatprep.mubr.msk.bf16.mxu1 %vm1508_vm0, %v1507_v0 }
  0x5f   :  { %1195 = vmatpush3.bf16.msra.mxu0 %v1342_v22  ;;  %1215 = vmatpush3.bf16.msra.mxu1 %v1343_v23  ;;  %v1368_v22 = vld [vmem:[#allocation5 + $0x8c] ss:$16 sps:$4 sm:$0xff]  }
  0x60   :  { %1196 = vmatprep.subr.bf16.mxu0 %v1507_v0  ;;  %1216 = vmatprep.subr.bf16.mxu1 %v1507_v0  ;;  %v1369_v23 = vld [vmem:[#allocation5 + $0xac] ss:$16 sps:$4 sm:$0xff]  }
  0x63   :  { %1197 = vmatpush3.bf16.msra.mxu0 %v1344_v24  ;;  %1217 = vmatpush3.bf16.msra.mxu1 %v1345_v25  ;;  %v1370_v24 = vld [vmem:[#allocation5 + $0xcc] ss:$16 sps:$4 sm:$0xff]  }
  0x64   :  { %1198 = vmatprep.subr.bf16.mxu0 %v1507_v0  ;;  %1218 = vmatprep.subr.bf16.mxu1 %v1507_v0  ;;  %v1371_v25 = vld [vmem:[#allocation5 + $0xec] ss:$16 sps:$4 sm:$0xff]  }
  0x67   :  { %1199 = vmatpush3.bf16.msra.mxu0 %v1346_v26  ;;  %1219 = vmatpush3.bf16.msra.mxu1 %v1347_v27  ;;  %v1372_v26 = vld [vmem:[#allocation7 + $0x80] sm:$0xff]   ;;  %v1373_v27 = vld [vmem:[#allocation7 + $0x88] sm:$0xff]  }
  0x68   :  { %1200 = vmatprep.subr.bf16.mxu0 %v1507_v0  ;;  %1220 = vmatprep.subr.bf16.mxu1 %v1507_v0 }
  0x6b   :  { %1201 = vmatpush3.bf16.msra.mxu0 %v1348_v28  ;;  %1221 = vmatpush3.bf16.msra.mxu1 %v1349_v29  ;;  %v1374_v28 = vld [vmem:[#allocation7 + $0x90] sm:$0xff]   ;;  %v1375_v29 = vld [vmem:[#allocation7 + $0x98] sm:$0xff]  }
  0x6c   :  { %1202 = vmatprep.subr.bf16.mxu0 %v1507_v0  ;;  %1222 = vmatprep.subr.bf16.mxu1 %v1507_v0 }
  0x6f   :  { %1203 = vmatpush3.bf16.msra.mxu0 %v1350_v30  ;;  %1223 = vmatpush3.bf16.msra.mxu1 %v1351_v31  ;;  %v1376_v30 = vld [vmem:[#allocation7 + $0xa0] sm:$0xff]   ;;  %v1378_v31 = vld [vmem:[#allocation7 + $0xb0] sm:$0xff]  }
  0x70   :  { %1204 = vmatprep.subr.bf16.mxu0 %v1507_v0  ;;  %1224 = vmatprep.subr.bf16.mxu1 %v1507_v0 }
  0x73   :  { %1205 = vmatpush3.bf16.msra.mxu0 %v1352_v32  ;;  %1225 = vmatpush3.bf16.msra.mxu1 %v1353_v33  ;;  %v1379_v32 = vld [vmem:[#allocation7 + $0xb8] sm:$0xff]  }
  0x74   :  { %1206 = vmatprep.subr.bf16.mxu0 %v1507_v0  ;;  %1226 = vmatprep.subr.bf16.mxu1 %v1507_v0 }
  0x77   :  { %1207 = vmatpush3.bf16.msra.mxu0 %v1354_v34  ;;  %1227 = vmatpush3.bf16.msra.mxu1 %v1355_v35 }
  0x78   :  { %1232 = vmatprep.subr.bf16.mxu0 %v1507_v0  ;;  %1252 = vmatprep.subr.bf16.mxu1 %v1507_v0 }
 0x12d   :  { %v171_v38 = vpop.f32.mrb[0].mxu0  ;;  %v310_v40 = vpop.f32.mrb[0].mxu1 }
 0x12e   :  { %v172_v39 = vadd.f32 %v1011_v36, %v171_v38  ;;  %v1170_v41 = vpop.f32.mrb[1].mxu0  ;;  %v311_v42 = vadd.f32 %v1020_v37, %v310_v40  ;;  %v1190_v43 = vpop.f32.mrb[1].mxu1 }
 0x12f   :  { %v174_v44 = vpop.f32.mrb[2].mxu0  ;;  %v313_v47 = vpop.f32.mrb[2].mxu1  ;;  %v1045_v43 = vld [vmem:[%s1703_s2 + $0x2] ss:$0 sm:$0xff] }
 0x130   :  { %v180_v45 = vmul.f32 0.70710677, %v172_v39  ;;  %v175_v46 = vadd.f32 %v1011_v36, %v174_v44  ;;  %v1171_v48 = vpop.f32.mrb[3].mxu0  ;;  %v319_v49 = vmul.f32 0.70710677, %v311_v42  ;;  %v314_v50 = vadd.f32 %v1020_v37, %v313_v47  ;;  %v1191_v51 = vpop.f32.mrb[3].mxu1 }
 0x131   :  { %v178_v54 = vmul.f32 0.5, %v172_v39  ;;  %v317_v1 = vmul.f32 0.5, %v311_v42 }
 0x132   :  { %1388 = verf.f32 %v180_v45  ;;  %v181_v52 = vmul.f32 0.70710677, %v175_v46  ;;  %v320_v53 = vmul.f32 0.70710677, %v314_v50  ;;  %v179_v58 = vmul.f32 0.5, %v175_v46 }
 0x133   :  { %1390 = verf.f32 %v319_v49  ;;  %v318_v2 = vmul.f32 0.5, %v314_v50 }
 0x134   :  { %1392 = verf.f32 %v181_v52 }
 0x135   :  { %1394 = verf.f32 %v320_v53 }
 0x13c   :  { %v1389_v55 = vpop.eup %1388 }
 0x13d   :  { %v1391_v56 = vpop.eup %1390  ;;  %v184_v57 = vadd.f32 1.0, %v1389_v55 }
 0x13e   :  { %v1393_v59 = vpop.eup %1392  ;;  %v323_v60 = vadd.f32 1.0, %v1391_v56 }
 0x13f   :  { %v1395_v61 = vpop.eup %1394  ;;  %v186_v62 = vmul.f32 %v184_v57, %v178_v54  ;;  %v185_v63 = vadd.f32 1.0, %v1393_v59 }
 0x140   :  { %v324_v3 = vadd.f32 1.0, %v1395_v61  ;;  %v325_v5 = vmul.f32 %v323_v60, %v317_v1  ;;  %v1380_v60 = vld [vmem:[#allocation7 + $0xc0] sm:$0xff]   ;;  %v1062_v1 = vld [vmem:[%s1703_s2 + $0x3] ss:$0 sm:$0xff] }
 0x141   :  { %v187_v4 = vmul.f32 %v185_v63, %v179_v58  ;;  %v1382_v63 = vld [vmem:[#allocation7 + $0xd0] sm:$0xff]  }
 0x142   :  { %v326_v6 = vmul.f32 %v324_v3, %v318_v2 }
 0x143   :  { %v188_v7 = vpack.c.bf16 %v187_v4, %v186_v62  ;;  %v1381_v62 = vld [vmem:[#allocation7 + $0xc8] sm:$0xff]  }
 0x144   :  { %v327_v9 = vpack.c.bf16 %v326_v6, %v325_v5  ;;  %v1383_v5 = vld [vmem:[#allocation7 + $0xd8] sm:$0xff]  }
 0x145   :  { %1229 = vmatmul.mubr.bf16.vlgmr.msra.gmra.mrb[4].mxu1 %v188_v7 }
 0x146   :  { %1209 = vmatmul.mubr.bf16.vlgmr.msra.gmra.mrb[4].mxu0 %v327_v9  ;;  %1268 = vmatprep.mubr.msk.bf16.mxu1 %vm1508_vm0, %v1507_v0 }
 0x147   :  { %1233 = vmatpush3.bf16.msra.mxu0 %v1356_v8  ;;  %1248 = vmatprep.mubr.msk.bf16.mxu0 %vm1508_vm0, %v1507_v0 }
 0x148   :  { %1234 = vmatprep.subr.bf16.mxu0 %v1507_v0  ;;  %1253 = vmatpush3.bf16.msra.mxu1 %v1372_v26 }
 0x149   :  { %1254 = vmatprep.subr.bf16.mxu1 %v1507_v0 }
 0x14b   :  { %1235 = vmatpush3.bf16.msra.mxu0 %v1357_v10 }
 0x14c   :  { %1236 = vmatprep.subr.bf16.mxu0 %v1507_v0  ;;  %1255 = vmatpush3.bf16.msra.mxu1 %v1373_v27 }
 0x14d   :  { %1256 = vmatprep.subr.bf16.mxu1 %v1507_v0 }
 0x14f   :  { %1237 = vmatpush3.bf16.msra.mxu0 %v1358_v11  ;;  %v1384_v11 = vld [vmem:[#allocation7 + $0xe0] sm:$0xff]  }
 0x150   :  { %1238 = vmatprep.subr.bf16.mxu0 %v1507_v0  ;;  %1257 = vmatpush3.bf16.msra.mxu1 %v1374_v28 }
 0x151   :  { %1258 = vmatprep.subr.bf16.mxu1 %v1507_v0 }
 0x153   :  { %1239 = vmatpush3.bf16.msra.mxu0 %v1359_v12  ;;  %v1385_v12 = vld [vmem:[#allocation7 + $0xe8] sm:$0xff]  }
 0x154   :  { %1240 = vmatprep.subr.bf16.mxu0 %v1507_v0  ;;  %1259 = vmatpush3.bf16.msra.mxu1 %v1375_v29 }
 0x155   :  { %1260 = vmatprep.subr.bf16.mxu1 %v1507_v0 }
 0x157   :  { %1241 = vmatpush3.bf16.msra.mxu0 %v1360_v13  ;;  %v1386_v13 = vld [vmem:[#allocation7 + $0xf0] sm:$0xff]  }
 0x158   :  { %1242 = vmatprep.subr.bf16.mxu0 %v1507_v0  ;;  %1261 = vmatpush3.bf16.msra.mxu1 %v1376_v30 }
 0x159   :  { %1262 = vmatprep.subr.bf16.mxu1 %v1507_v0 }
 0x15b   :  { %1243 = vmatpush3.bf16.msra.mxu0 %v1361_v14 }
 0x15c   :  { %1244 = vmatprep.subr.bf16.mxu0 %v1507_v0 }
 0x15f   :  { %1245 = vmatpush3.bf16.msra.mxu0 %v1362_v15 }
 0x160   :  { %1246 = vmatprep.subr.bf16.mxu0 %v1507_v0 }
 0x163   :  { %1247 = vmatpush3.bf16.msra.mxu0 %v1363_v16 }
 0x164   :  { %1272 = vmatprep.subr.bf16.mxu0 %v1507_v0 }
 0x166   :  { %1249 = vmatmul.mubr.bf16.vlgmr.msra.gmra.mrb[8].mxu0 %v1599_v20 }
 0x167   :  { %1273 = vmatpush3.bf16.msra.mxu0 %v1364_v17  ;;  %1288 = vmatprep.mubr.msk.bf16.mxu0 %vm1508_vm0, %v1507_v0  ;;  %v1387_v17 = vld [vmem:[#allocation7 + $0xf8] sm:$0xff]  }
 0x168   :  { %1274 = vmatprep.subr.bf16.mxu0 %v1507_v0 }
 0x16b   :  { %1275 = vmatpush3.bf16.msra.mxu0 %v1365_v18 }
 0x16c   :  { %1276 = vmatprep.subr.bf16.mxu0 %v1507_v0 }
 0x16f   :  { %1277 = vmatpush3.bf16.msra.mxu0 %v1366_v19 }
 0x170   :  { %1278 = vmatprep.subr.bf16.mxu0 %v1507_v0 }
 0x173   :  { %1279 = vmatpush3.bf16.msra.mxu0 %v1367_v21 }
 0x174   :  { %1280 = vmatprep.subr.bf16.mxu0 %v1507_v0 }
 0x177   :  { %1281 = vmatpush3.bf16.msra.mxu0 %v1368_v22 }
 0x178   :  { %1282 = vmatprep.subr.bf16.mxu0 %v1507_v0 }
 0x17b   :  { %1283 = vmatpush3.bf16.msra.mxu0 %v1369_v23 }
 0x17c   :  { %1284 = vmatprep.subr.bf16.mxu0 %v1507_v0 }
 0x17f   :  { %1285 = vmatpush3.bf16.msra.mxu0 %v1370_v24 }
 0x180   :  { %1286 = vmatprep.subr.bf16.mxu0 %v1507_v0 }
 0x183   :  { %1287 = vmatpush3.bf16.msra.mxu0 %v1371_v25 }
 0x186   :  { %1289 = vmatmul.mubr.bf16.vlgmr.msra.gmra.mrb[12].mxu0 %v1599_v20  ;;  %v1377_v20 = vld [vmem:[#allocation7 + $0xa8] sm:$0xff]  }
 0x187   :  { %1263 = vmatpush3.bf16.msra.mxu1 %v1377_v20 }
 0x188   :  { %1264 = vmatprep.subr.bf16.mxu1 %v1507_v0 }
 0x18b   :  { %1265 = vmatpush3.bf16.msra.mxu1 %v1378_v31  ;;  %v1079_v31 = vld [vmem:[%s1705_s4] ss:$0 sm:$0xff] }
 0x18c   :  { %1266 = vmatprep.subr.bf16.mxu1 %v1507_v0 }
 0x18f   :  { %1267 = vmatpush3.bf16.msra.mxu1 %v1379_v32 }
 0x190   :  { %1292 = vmatprep.subr.bf16.mxu1 %v1507_v0 }
 0x218   :  { %v515_v33 = vpop.f32.mrb[4].mxu1 }
 0x219   :  { %v426_v34 = vpop.f32.mrb[4].mxu0  ;;  %v1230_v35 = vpop.f32.mrb[5].mxu1 }
 0x21a   :  { %v1662_v36 = vadd.f32 %v515_v33, %v426_v34  ;;  %v1210_v37 = vpop.f32.mrb[5].mxu0  ;;  %v518_v38 = vpop.f32.mrb[6].mxu1 }
 0x21b   :  { %v429_v39 = vpop.f32.mrb[6].mxu0  ;;  %v1231_v40 = vpop.f32.mrb[7].mxu1 }
 0x21c   :  { %v1664_v41 = vadd.f32 %v518_v38, %v429_v39  ;;  %v1211_v42 = vpop.f32.mrb[7].mxu0 }
 0x239   :  { %v627_v44 = vpop.f32.mrb[8].mxu0 }
 0x23a   :  { %v628_v45 = vadd.f32 %v1045_v43, %v627_v44  ;;  %v1250_v46 = vpop.f32.mrb[9].mxu0 }
 0x23b   :  { %v630_v47 = vpop.f32.mrb[10].mxu0 }
 0x23c   :  { %v636_v48 = vmul.f32 0.70710677, %v628_v45  ;;  %v631_v49 = vadd.f32 %v1045_v43, %v630_v47  ;;  %v1251_v50 = vpop.f32.mrb[11].mxu0  ;;  %v634_v55 = vmul.f32 0.5, %v628_v45 }
 0x23e   :  { %1396 = verf.f32 %v636_v48  ;;  %v637_v51 = vmul.f32 0.70710677, %v631_v49  ;;  %v635_v56 = vmul.f32 0.5, %v631_v49 }
 0x240   :  { %1398 = verf.f32 %v637_v51 }
 0x248   :  { %v1397_v52 = vpop.eup %1396 }
 0x249   :  { %v640_v53 = vadd.f32 1.0, %v1397_v52 }
 0x24a   :  { %v1399_v54 = vpop.eup %1398 }
 0x24b   :  { %v641_v57 = vadd.f32 1.0, %v1399_v54  ;;  %v642_v58 = vmul.f32 %v640_v53, %v634_v55 }
 0x24d   :  { %v643_v59 = vmul.f32 %v641_v57, %v635_v56 }
 0x24f   :  { %v644_v61 = vpack.c.bf16 %v643_v59, %v642_v58 }
 0x251   :  { %1269 = vmatmul.mubr.bf16.vlgmr.msra.gmra.mrb[8].mxu1 %v644_v61 }
 0x252   :  { %1293 = vmatpush3.bf16.msra.mxu1 %v1380_v60  ;;  %1308 = vmatprep.mubr.msk.bf16.mxu1 %vm1508_vm0, %v1507_v0 }
 0x253   :  { %1294 = vmatprep.subr.bf16.mxu1 %v1507_v0 }
 0x256   :  { %1295 = vmatpush3.bf16.msra.mxu1 %v1381_v62 }
 0x257   :  { %1296 = vmatprep.subr.bf16.mxu1 %v1507_v0 }
 0x259   :  { %v857_v2 = vpop.f32.mrb[12].mxu0 }
 0x25a   :  { %v858_v3 = vadd.f32 %v1062_v1, %v857_v2  ;;  %v1290_v4 = vpop.f32.mrb[13].mxu0  ;;  %1297 = vmatpush3.bf16.msra.mxu1 %v1382_v63 }
 0x25b   :  { %v860_v6 = vpop.f32.mrb[14].mxu0  ;;  %1298 = vmatprep.subr.bf16.mxu1 %v1507_v0 }
 0x25c   :  { %v866_v7 = vmul.f32 0.70710677, %v858_v3  ;;  %v861_v8 = vadd.f32 %v1062_v1, %v860_v6  ;;  %v1291_v9 = vpop.f32.mrb[15].mxu0  ;;  %v864_v18 = vmul.f32 0.5, %v858_v3 }
 0x25e   :  { %1400 = verf.f32 %v866_v7  ;;  %v867_v10 = vmul.f32 0.70710677, %v861_v8  ;;  %1299 = vmatpush3.bf16.msra.mxu1 %v1383_v5  ;;  %v865_v19 = vmul.f32 0.5, %v861_v8 }
 0x25f   :  { %1300 = vmatprep.subr.bf16.mxu1 %v1507_v0 }
 0x260   :  { %1402 = verf.f32 %v867_v10 }
 0x262   :  { %1301 = vmatpush3.bf16.msra.mxu1 %v1384_v11 }
 0x263   :  { %1302 = vmatprep.subr.bf16.mxu1 %v1507_v0 }
 0x266   :  { %1303 = vmatpush3.bf16.msra.mxu1 %v1385_v12 }
 0x267   :  { %1304 = vmatprep.subr.bf16.mxu1 %v1507_v0 }
 0x268   :  { %v1401_v14 = vpop.eup %1400 }
 0x269   :  { %v870_v15 = vadd.f32 1.0, %v1401_v14 }
 0x26a   :  { %v1403_v16 = vpop.eup %1402  ;;  %1305 = vmatpush3.bf16.msra.mxu1 %v1386_v13 }
 0x26b   :  { %v871_v21 = vadd.f32 1.0, %v1403_v16  ;;  %1306 = vmatprep.subr.bf16.mxu1 %v1507_v0  ;;  %v872_v22 = vmul.f32 %v870_v15, %v864_v18 }
 0x26d   :  { %v873_v23 = vmul.f32 %v871_v21, %v865_v19 }
 0x26e   :  { %1307 = vmatpush3.bf16.msra.mxu1 %v1387_v17 }
 0x26f   :  { %v874_v24 = vpack.c.bf16 %v873_v23, %v872_v22 }
 0x271   :  { %1309 = vmatmul.mubr.bf16.vlgmr.msra.gmra.mrb[12].mxu1 %v874_v24 }
 0x324   :  { %v743_v25 = vpop.f32.mrb[8].mxu1 }
 0x325   :  { %v750_v26 = vadd.f32 %v743_v25, %v1662_v36  ;;  %v1270_v27 = vpop.f32.mrb[9].mxu1 }
 0x326   :  { %v746_v28 = vpop.f32.mrb[10].mxu1 }
 0x327   :  { %v751_v29 = vadd.f32 %v746_v28, %v1664_v41  ;;  %v1271_v30 = vpop.f32.mrb[11].mxu1 }
 0x344   :  { %v973_v20 = vpop.f32.mrb[12].mxu1 }
 0x345   :  { %v980_v32 = vadd.f32 %v973_v20, %v750_v26  ;;  %v1310_v0 = vpop.f32.mrb[13].mxu1 }
 0x346   :  { %v976_v33 = vpop.f32.mrb[14].mxu1 }
 0x347   :  { %v989_v34 = vadd.f32 %v1079_v31, %v980_v32  ;;  %v981_v35 = vadd.f32 %v976_v33, %v751_v29  ;;  %v1311_v37 = vpop.f32.mrb[15].mxu1 }
 0x349   :  { %991 = vst [vmem:[#allocation8] sm:$0xff] %v989_v34  ;;  %v990_v36 = vadd.f32 %v1079_v31, %v981_v35 }
 0x34b   :  { %992 = vst [vmem:[#allocation8 + $0x8] sm:$0xff] %v990_v36 }
 0x34c   :  { %1481 = shalt.err (!%p1478_p0)
}
 0x34d   :  { %s1482_s21 = scalar_lea.hbm %s1706_s5, 256 }
 0x34e   :  { %p1483_p1 = scmp.ne.s32.totalorder %s1706_s5, %s1482_s21  ;;  %p1486_p2 = scmp.lt.u32.totalorder %s1482_s21, %s1706_s5 }
 0x350   :  { %p1488_p3 = pnand %p1486_p2, %p1483_p1 }
 0x352   :  { %1491 = shalt.err (!%p1488_p3)
}
 0x353   :  { %1004 = dma.vmem_to_hbm [thread:$0]  %s999_s18, 256, %s1706_s5, [#allocation4], %s1502_s1, %s1502_s1, %s1503_s17  }
 0x354   :  { %1496 = dma.done.wait [#allocation4], 256  }
 0x355   :  { %1497 = vsyncadd [#allocation4], 4294967040 }
 0x356   :  { %1008 = vsyncpa [#allocation3], 1 }
 0x357   :  { %1009 = vsyncpa [#allocation6], 1 }
 0x358   :  { %1010 = vsyncpa [#allocation4], 1 }

</bundles_post_ra>
